<compile_context>
chip_gen: v7x
topology: tpu7x:2x2x1
jax: 0.10.0
libtpu: 0.0.40
codegen_flags: <defaults>
</compile_context>

<pallas_src>
import math

import numpy as np
import jax
import jax.numpy as jnp
from jax.experimental import pallas as pl
from jax.experimental.pallas import tpu as pltpu


# ----------------------------------------------------------------------------
# Module-equivalent parameter setup (mirrors Ex4bitLinear.__init__).
# qweight: int32 [in_features // 8, out_features]   (8 x 4-bit packed per int32)
# qzeros : int32 [n_groups, out_features // 8]
# scales : f32   [n_groups, out_features]
# bias   : f32   [out_features]                      (optional)
# ----------------------------------------------------------------------------
def make_ex4bit_params(in_features, out_features, groupsize, has_bias, key):
    # Explicit divisibility checks (previously only implicit via // ):
    assert in_features % 8 == 0, "in_features must be divisible by 8 (4-bit packing)"
    assert out_features % 8 == 0, "out_features must be divisible by 8 (4-bit packing)"
    assert in_features % groupsize == 0, "in_features must be divisible by groupsize"
    n_groups = in_features // groupsize
    k_qw, k_qz, k_sc, k_b = jax.random.split(key, 4)
    qweight = jax.random.randint(
        k_qw, (in_features // 8, out_features),
        minval=-(2**31), maxval=2**31 - 1, dtype=jnp.int32)
    qzeros = jax.random.randint(
        k_qz, (n_groups, out_features // 8),
        minval=-(2**31), maxval=2**31 - 1, dtype=jnp.int32)
    scales = jax.random.uniform(k_sc, (n_groups, out_features), jnp.float32,
                                minval=0.001, maxval=0.01)
    bias = (jax.random.normal(k_b, (out_features,), jnp.float32)
            if has_bias else None)
    # groupsize derivation check mirroring __init__:
    derived_groupsize = (qweight.shape[0] * 8) // qzeros.shape[0]
    assert derived_groupsize == groupsize
    return dict(qweight=qweight, qzeros=qzeros, scales=scales, bias=bias,
                groupsize=derived_groupsize)


# ----------------------------------------------------------------------------
# Layout helpers: flatten to a lane-dense 2-D slab [rows, lane] with
# lane a large multiple of 128, then tile rows for VMEM / dual-TC.
# ----------------------------------------------------------------------------
def _factor_lane_dense(total):
    """Pick (rows, lane): lane is the largest multiple-of-128 divisor of
    `total` (capped at 2048), preferring factorizations with rows >= 8 so the
    row axis can be tiled. Falls back to a single (1, total) row."""
    for lane in (2048, 1024, 512, 256, 128):
        if total % lane == 0 and total // lane >= 8:
            return total // lane, lane
    for lane in (2048, 1024, 512, 256, 128):
        if total % lane == 0:
            return total // lane, lane
    return 1, total  # last resort: may use masked partial stores


def _row_tile(rows, lane, itemsize, vmem_tile_budget=4 * 1024 * 1024):
    """Largest row tile that (a) is a multiple of 8 and divides rows,
    (b) keeps one tile <= ~4 MiB so in+out double buffering (4 live buffers)
    stays well inside v7x's 32 MiB scoped-VMEM default, and (c) leaves >= 2
    grid steps when possible so v7x's second TensorCore gets work."""
    if rows < 8 or rows % 8 != 0:
        return rows  # full-dim block, single grid step (tiny inputs)
    cap = max(8, (vmem_tile_budget // (lane * itemsize)) // 8 * 8)
    if rows >= 16:
        half = (rows // 2) // 8 * 8
        if half >= 8:
            cap = min(cap, half)  # guarantee >= 2 grid steps
    cap = min(cap, rows)
    best = 8
    t = 8
    while t <= cap:
        if rows % t == 0:
            best = t
        t += 8
    return best


# ----------------------------------------------------------------------------
# Pallas kernel: identity pass-through (== Ex4bitLinear.forward).
# ----------------------------------------------------------------------------
def _copy_kernel(x_ref, o_ref):
    o_ref[...] = x_ref[...]


def ex4bit_linear_forward(x):
    """Identity forward (the spec's forward returns x untouched).

    Implemented as a lane-dense tiled Pallas copy with input_output_aliases so
    that, when called under jit with a donated input, the output can reuse the
    input's HBM buffer and the writeback becomes (near-)free.
    """
    # TODO(synk): the module's dequant-matmul path (qweight/qzeros/scales) is
    # not part of forward() in the reference implementation and is not faked.
    orig_shape = x.shape
    total = math.prod(orig_shape) if orig_shape else 1
    rows, lane = _factor_lane_dense(total)
    tile_rows = _row_tile(rows, lane, jnp.dtype(x.dtype).itemsize)
    x2 = x.reshape(rows, lane)

    y2 = pl.pallas_call(
        _copy_kernel,
        out_shape=jax.ShapeDtypeStruct((rows, lane), x.dtype),
        grid_spec=pltpu.PrefetchScalarGridSpec(
            num_scalar_prefetch=0,
            grid=(rows // tile_rows,),
            in_specs=[pl.BlockSpec((tile_rows, lane), lambda i: (i, 0))],
            out_specs=pl.BlockSpec((tile_rows, lane), lambda i: (i, 0)),
        ),
        input_output_aliases={0: 0},
        compiler_params=pltpu.CompilerParams(
            dimension_semantics=("parallel",)),
    )(x2)
    return y2.reshape(orig_shape)


if __name__ == "__main__":
    key = jax.random.PRNGKey(0)
    k_x, k_p = jax.random.split(key)

    batch, seq = 2, 8
    in_features, out_features = 32, 32
    groupsize = 16

    # Module parameters (mirrors __init__; unused by forward, by design).
    params = make_ex4bit_params(in_features, out_features, groupsize,
                                has_bias=True, key=k_p)

    # Input: [batch, seq, in_features]
    x = jax.random.normal(k_x, (batch, seq, in_features), dtype=jnp.float32)
    x_host = np.asarray(x)  # snapshot before donation

    # Donate x so the input_output_aliases actually lets XLA reuse the buffer.
    forward = jax.jit(ex4bit_linear_forward, donate_argnums=0)
    y = jax.block_until_ready(forward(x))

    assert y.shape == x_host.shape and y.dtype == x_host.dtype
    assert np.array_equal(np.asarray(y), x_host)
    print("KERNEL_OK")
</pallas_src>

<mosaic_0001>
module attributes {stable_mosaic.version = 11 : i64} {
  func.func @_copy_kernel(%arg0: i32, %arg1: memref<1x512xf32, #tpu.memory_space<vmem>>, %arg2: memref<1x512xf32, #tpu.memory_space<vmem>>) attributes {dimension_semantics = [#tpu.dimension_semantics<parallel>], iteration_bounds = array<i64: 1>, scalar_prefetch = 0 : i64, scratch_operands = 0 : i64, tpu.core_type = #tpu.core_type<tc>, window_params = [{transform_indices = @transform_0, window_bounds = array<i64: 1, 512>}, {transform_indices = @transform_1, window_bounds = array<i64: 1, 512>}]} {
    %c0 = arith.constant 0 : index
    %c0_0 = arith.constant 0 : index
    %0 = vector.load %arg1[%c0, %c0_0] : memref<1x512xf32, #tpu.memory_space<vmem>>, vector<1x512xf32>
    %c0_1 = arith.constant 0 : index
    %c0_2 = arith.constant 0 : index
    %1 = vector.load %arg2[%c0_1, %c0_2] : memref<1x512xf32, #tpu.memory_space<vmem>>, vector<1x512xf32>
    tpu.vector_store %arg2[%c0_1, %c0_2], %0 {strides = array<i32>} : memref<1x512xf32, #tpu.memory_space<vmem>>, vector<1x512xf32>,
    return
  }
  func.func @transform_0(%arg0: i32) -> (i32, i32) {
    %c0_i32 = arith.constant 0 : i32
    %c0_i32_0 = arith.constant 0 : i32
    return %arg0, %c0_i32 : i32, i32
  }
  func.func @transform_1(%arg0: i32) -> (i32, i32) {
    %c0_i32 = arith.constant 0 : i32
    %c0_i32_0 = arith.constant 0 : i32
    return %arg0, %c0_i32 : i32, i32
  }
}

</mosaic_0001>

<bundles_post_ra>
// kernel: ex4bit_linear_forward.1
= control target key start
LH: loop header
LB: loop body
LE: loop exit
PB: predicated region body
PF: predicated region fallthrough
CT: control target
= control target key end

     0   :  { %v9_v0 = vlaneseq  ;;  %s34_s0 = inlined_call_operand.vmem [shape: f32[1,512], index: 0, kind: input, shape index: {}, may-alias: {0,1}]   ;;  %s35_s1 = inlined_call_operand.vmem [shape: f32[1,512], index: 1, kind: output, shape index: {}, may-alias: {0,1}]  }
   0x1   :  { %v8_v1 = vld [vmem:[%s34_s0] sm:$0xf] }
   0x2   :  { %vm11_vm0 = vcmp.lt.s32.totalorder %v9_v0, 512 }
   0x3   :  { %13 = vst.msk [vmem:[%s35_s1] sm:$0xf] %vm11_vm0, %v8_v1 }

</bundles_post_ra>
